<compile_context>
chip_gen: v7x
topology: tpu7x:2x2x1
jax: 0.10.0
libtpu: 0.0.40
codegen_flags: <defaults>
</compile_context>

<pallas_src>
import jax
import jax.numpy as jnp
from jax.experimental import pallas as pl
from jax.experimental.pallas import tpu as pltpu


_LANE_CANDIDATES = (8192, 4096, 2048, 1024, 512, 256, 128)
_DESIRED_GRID_STEPS = 8          # >= 2 TCs x pipeline depth x a few steps
_MAX_BLOCK_BYTES = 8 * 1024 * 1024


def _sublane_multiple(dtype):
    """Minimum sublane multiple for the dtype's packed layout."""
    itemsize = jnp.dtype(dtype).itemsize
    return {4: 8, 2: 16, 1: 32}.get(itemsize, 8)


def _is_v5():
    """True on v5e/v5p (no bf16 VPU/EUP -> keep the f32 compute path)."""
    try:
        return "v5" in jax.devices()[0].device_kind.lower()
    except Exception:  # pragma: no cover - conservative default
        return False


def _make_swish_kernel(compute_dtype):
    def _swish_kernel(x_ref, o_ref):
        x = x_ref[...].astype(compute_dtype)
        # swish(x) = x * sigmoid(x); sigmoid hits the EUP, mul hits the VPU,
        # both fully hidden under the HBM stream.
        o_ref[...] = (x * jax.nn.sigmoid(x)).astype(o_ref.dtype)
    return _swish_kernel


def _make_block_spec(block_shape, index_map, buffer_count=None):
    """BlockSpec with optional N-deep buffering; falls back if unsupported."""
    if buffer_count is not None and buffer_count > 2:
        try:
            return pl.BlockSpec(block_shape, index_map,
                                pipeline_mode=pl.Buffered(buffer_count))
        except Exception:
            pass
    return pl.BlockSpec(block_shape, index_map)


def _swish_2d(x2d, block_rows, lanes, compute_dtype):
    rows = x2d.shape[0]
    itemsize = jnp.dtype(x2d.dtype).itemsize
    grid_steps = pl.cdiv(rows, block_rows)
    block_bytes = block_rows * lanes * itemsize

    # 3-deep input buffering only pays off when the grid is deep enough to
    # actually stream; otherwise stick with the default double buffer.
    in_buffers = 3 if grid_steps >= 4 else None

    # Scoped VMEM: enough for (3 in + 2 out) buffers of the chosen block, never
    # below 32 MiB (v5e's 16 MiB default would pinch the pipeline), never above
    # 48 MiB (headroom against v7x's 64 MiB/TC physical VMEM).
    vmem_limit = int(min(48 << 20, max(32 << 20, 6 * block_bytes)))

    n = rows * lanes
    cost = pl.CostEstimate(
        flops=4 * n,                       # mul + sigmoid arithmetic (approx)
        transcendentals=n,                 # one exp per element
        bytes_accessed=2 * n * itemsize,   # read + write
    )

    return pl.pallas_call(
        _make_swish_kernel(compute_dtype),
        out_shape=jax.ShapeDtypeStruct(x2d.shape, x2d.dtype),
        grid_spec=pltpu.PrefetchScalarGridSpec(
            num_scalar_prefetch=0,
            grid=(grid_steps,),
            in_specs=[_make_block_spec((block_rows, lanes), lambda i: (i, 0),
                                       buffer_count=in_buffers)],
            out_specs=pl.BlockSpec((block_rows, lanes), lambda i: (i, 0)),
        ),
        compiler_params=pltpu.CompilerParams(
            # "parallel" lets the runtime shard the streaming axis across both
            # v7x TensorCores; the grid-depth cap above guarantees there are
            # enough steps to feed them.
            dimension_semantics=("parallel",),
            vmem_limit_bytes=vmem_limit,
        ),
        cost_estimate=cost,
    )(x2d)


def swish_pallas(x, *, target_block_bytes=4 * 1024 * 1024):
    """Elementwise swish over an arbitrary-shaped array via a Pallas kernel."""
    orig_shape = x.shape
    dtype = x.dtype
    n = x.size
    if n == 0:
        return x

    itemsize = jnp.dtype(dtype).itemsize
    sublane = _sublane_multiple(dtype)
    target_block_bytes = max(lanes_bytes := 128 * itemsize,
                             min(int(target_block_bytes), _MAX_BLOCK_BYTES))

    # bf16-native compute on v6e/v7x; f32 everywhere else (safe on v5e).
    if dtype == jnp.bfloat16 and not _is_v5():
        compute_dtype = jnp.bfloat16
    else:
        compute_dtype = jnp.float32

    xf = jnp.reshape(x, (-1,))

    # --- lane-dense slab layout: [rows, lanes], lanes a multiple of 128.
    # Prefer a lane width that leaves >= 8*sublane rows so the grid-depth cap
    # below can keep both TCs + the DMA pipeline busy; otherwise take the
    # widest divisor.
    lanes = None
    for cand in _LANE_CANDIDATES:
        if n % cand == 0 and n // cand >= _DESIRED_GRID_STEPS * sublane:
            lanes = cand
            break
    if lanes is None:
        for cand in _LANE_CANDIDATES:
            if n % cand == 0:
                lanes = cand
                break

    pad = 0
    if lanes is None:
        # Rare fallback (size not a multiple of 128): pad only to the next
        # multiple of 128; the cdiv grid handles partial row-blocks and
        # swish(0) == 0 keeps the zero pad numerically safe.
        lanes = 128
        pad = (-n) % lanes
        xf = jnp.concatenate([xf, jnp.zeros((pad,), dtype=dtype)])

    rows = (n + pad) // lanes
    x2d = jnp.reshape(xf, (rows, lanes))

    # --- block sizing: <= target_block_bytes, and capped so the grid has
    # ~_DESIRED_GRID_STEPS steps whenever the slab allows it.
    max_rows_for_budget = max(1, target_block_bytes // (lanes * itemsize))
    rows_for_depth = max(sublane, -(-rows // _DESIRED_GRID_STEPS))  # ceil div
    block_rows = min(rows, max_rows_for_budget, rows_for_depth)
    if block_rows < rows:
        # Partial blocks along the sublane dim must be a multiple of the
        # dtype's packed sublane count (lanes is already a multiple of 128).
        block_rows = max(sublane, (block_rows // sublane) * sublane)
    # If block_rows == rows the block equals the full dimension, which is
    # always a legal block shape regardless of sublane alignment.

    out2d = _swish_2d(x2d, block_rows, lanes, compute_dtype)

    out_flat = jnp.reshape(out2d, (-1,))
    if pad:
        out_flat = out_flat[:n]
    return jnp.reshape(out_flat, orig_shape)


if __name__ == "__main__":
    key = jax.random.PRNGKey(0)

    # NCHW input, same convention as the PyTorch module's callers.
    x = jax.random.normal(key, (2, 4, 16, 16), dtype=jnp.float32)
    out = jax.block_until_ready(swish_pallas(x))
    ref = x * jax.nn.sigmoid(x)
    assert out.shape == x.shape and out.dtype == x.dtype
    assert jnp.max(jnp.abs(out - ref)) < 1e-5

    # Exercise the multi-block (grid > 1, "parallel", Buffered(3)) path with a
    # small artificial block budget.
    x2 = jax.random.normal(jax.random.PRNGKey(1), (4, 64, 32, 32), jnp.float32)
    out2 = jax.block_until_ready(swish_pallas(x2, target_block_bytes=64 * 1024))
    ref2 = x2 * jax.nn.sigmoid(x2)
    assert jnp.max(jnp.abs(out2 - ref2)) < 1e-5

    # Exercise the padding fallback (size not a multiple of 128).
    x3 = jax.random.normal(jax.random.PRNGKey(2), (3, 5, 7), jnp.float32)
    out3 = jax.block_until_ready(swish_pallas(x3))
    ref3 = x3 * jax.nn.sigmoid(x3)
    assert out3.shape == x3.shape
    assert jnp.max(jnp.abs(out3 - ref3)) < 1e-5

    # bf16 path (native bf16 compute on v6e/v7x, f32 on v5e).
    x4 = jax.random.normal(jax.random.PRNGKey(3), (2, 8, 16, 16)).astype(jnp.bfloat16)
    out4 = jax.block_until_ready(swish_pallas(x4))
    ref4 = (x4.astype(jnp.float32) * jax.nn.sigmoid(x4.astype(jnp.float32)))
    assert out4.dtype == jnp.bfloat16
    assert jnp.max(jnp.abs(out4.astype(jnp.float32) - ref4)) < 2e-2

    print("KERNEL_OK")
</pallas_src>

<mosaic_0001>
module attributes {stable_mosaic.version = 11 : i64} {
  func.func @_swish_kernel(%arg0: i32, %arg1: memref<1x2048xf32, #tpu.memory_space<vmem>>, %arg2: memref<1x2048xf32, #tpu.memory_space<vmem>>) attributes {dimension_semantics = [#tpu.dimension_semantics<parallel>], iteration_bounds = array<i64: 1>, scalar_prefetch = 0 : i64, scratch_operands = 0 : i64, tpu.core_type = #tpu.core_type<tc>, window_params = [{transform_indices = @transform_0, window_bounds = array<i64: 1, 2048>}, {transform_indices = @transform_1, window_bounds = array<i64: 1, 2048>}]} {
    %c0 = arith.constant 0 : index
    %c0_0 = arith.constant 0 : index
    %0 = vector.load %arg1[%c0, %c0_0] : memref<1x2048xf32, #tpu.memory_space<vmem>>, vector<1x2048xf32>
    %1 = arith.negf %0 : vector<1x2048xf32>
    %2 = math.exp %1 : vector<1x2048xf32>
    %cst = arith.constant 1.000000e+00 : f32
    %3 = vector.broadcast %cst : f32 to vector<1x2048xf32>
    %4 = arith.addf %3, %2 : vector<1x2048xf32>
    %5 = arith.divf %3, %4 : vector<1x2048xf32>
    %6 = arith.mulf %0, %5 : vector<1x2048xf32>
    %c0_1 = arith.constant 0 : index
    %c0_2 = arith.constant 0 : index
    %7 = vector.load %arg2[%c0_1, %c0_2] : memref<1x2048xf32, #tpu.memory_space<vmem>>, vector<1x2048xf32>
    tpu.vector_store %arg2[%c0_1, %c0_2], %6 {strides = array<i32>} : memref<1x2048xf32, #tpu.memory_space<vmem>>, vector<1x2048xf32>,
    return
  }
  func.func @transform_0(%arg0: i32) -> (i32, i32) {
    %c0_i32 = arith.constant 0 : i32
    %c0_i32_0 = arith.constant 0 : i32
    return %arg0, %c0_i32 : i32, i32
  }
  func.func @transform_1(%arg0: i32) -> (i32, i32) {
    %c0_i32 = arith.constant 0 : i32
    %c0_i32_0 = arith.constant 0 : i32
    return %arg0, %c0_i32 : i32, i32
  }
}

</mosaic_0001>

<bundles_post_ra>
// kernel: tpu_custom_call.1
= control target key start
LH: loop header
LB: loop body
LE: loop exit
PB: predicated region body
PF: predicated region fallthrough
CT: control target
= control target key end

     0   :  { %6 = vsyncpa [#allocation3], 0  ;;  %s150_s0 = inlined_call_operand.hbm [shape: f32[1,2048], index: 0, kind: input, shape index: {}]   ;;  %s151_s1 = inlined_call_operand.hbm [shape: f32[1,2048], index: 1, kind: output, shape index: {}]  }
   0x1   :  { %7 = vsyncpa [#allocation4], 0  ;;  %s114_s6 = smov [#allocation2]   ;;  %s66_s10 = scalar_lea.hbm %s150_s0, 256 }
   0x2   :  { %s14_s7 = sshll.u32 %s114_s6, 4  ;;  %p67_p0 = scmp.ne.s32.totalorder %s150_s0, %s66_s10  ;;  %s15_s7 = int_to_ptr.vmem [resolvable:$true] %s14_s7 }
   0x3   :  { %p70_p1 = scmp.lt.u32.totalorder %s66_s10, %s150_s0 }
   0x5   :  { %p72_p2 = pnand %p70_p1, %p67_p0 }
   0x7   :  { %75 = shalt.err (!%p72_p2)
}
   0x8   :  { %s76_s15 = scalar_lea.vmem %s15_s7, 256  ;;  %p81_p4 = scmp.lt.s32.totalorder %s15_s7, %s15_s7 }
   0x9   :  { %p77_p3 = scmp.ne.s32.totalorder %s15_s7, %s76_s15  ;;  %p82_p5 = scmp.lt.s32.totalorder %s76_s15, %s76_s15 }
   0xb   :  { %p83_p6 = por %p82_p5, %p81_p4 }
   0xd   :  { %p84_p7 = pnand %p83_p6, %p77_p3 }
   0xf   :  { %87 = shalt.err (!%p84_p7)
}
  0x10   :  { %17 = dma.hbm_to_vmem [thread:$0]  %s150_s0, 256, %s15_s7, [#allocation3]  }
  0x11   :  { %110 = dma.done.wait [#allocation3], 256  }
  0x12   :  { %111 = vsyncadd [#allocation3], 4294967040  ;;  %v21_v0 = vld [vmem:[#allocation2] sm:$0xff]  ;;  %v22_v1 = vld [vmem:[#allocation2 + $0x8] sm:$0xff]  ;;  %s115_s18 = smov [#allocation5]  }
  0x13   :  { %v54_v2 = vmul.f32 -1.442695, %v21_v0  ;;  %v55_v3 = vmul.f32 -1.442695, %v22_v1  ;;  %s45_s19 = sshll.u32 %s115_s18, 4  ;;  %s46_s19 = int_to_ptr.vmem [resolvable:$true] %s45_s19 }
  0x14   :  { %s88_s0 = scalar_lea.vmem %s46_s19, 256  ;;  %p93_p9 = scmp.lt.s32.totalorder %s46_s19, %s46_s19 }
  0x15   :  { %58 = vpow2.f32 %v54_v2  ;;  %p89_p8 = scmp.ne.s32.totalorder %s46_s19, %s88_s0  ;;  %p94_p10 = scmp.lt.s32.totalorder %s88_s0, %s88_s0 }
  0x16   :  { %60 = vpow2.f32 %v55_v3 }
  0x17   :  { %p95_p11 = por %p94_p10, %p93_p9 }
  0x19   :  { %p96_p12 = pnand %p95_p11, %p89_p8 }
  0x1f   :  { %v59_v4 = vpop.eup %58 }
  0x20   :  { %v61_v5 = vpop.eup %60  ;;  %v29_v6 = vadd.f32 1.0, %v59_v4 }
  0x21   :  { %v30_v7 = vadd.f32 1.0, %v61_v5 }
  0x22   :  { %62 = vrcp.f32 %v29_v6 }
  0x23   :  { %64 = vrcp.f32 %v30_v7 }
  0x2c   :  { %v63_v8 = vpop.eup %62 }
  0x2d   :  { %v65_v9 = vpop.eup %64  ;;  %v35_v10 = vmul.f32 %v63_v8, %v21_v0 }
  0x2e   :  { %v36_v11 = vmul.f32 %v65_v9, %v22_v1 }
  0x2f   :  { %37 = vst [vmem:[#allocation5] sm:$0xff] %v35_v10 }
  0x30   :  { %38 = vst [vmem:[#allocation5 + $0x8] sm:$0xff] %v36_v11 }
  0x31   :  { %99 = shalt.err (!%p96_p12)
}
  0x32   :  { %s100_s22 = scalar_lea.hbm %s151_s1, 256 }
  0x33   :  { %p101_p13 = scmp.ne.s32.totalorder %s151_s1, %s100_s22  ;;  %p104_p0 = scmp.lt.u32.totalorder %s100_s22, %s151_s1 }
  0x35   :  { %p106_p1 = pnand %p104_p0, %p101_p13 }
  0x37   :  { %109 = shalt.err (!%p106_p1)
}
  0x38   :  { %48 = dma.vmem_to_hbm [thread:$0]  %s46_s19, 256, %s151_s1, [#allocation4]  }
  0x39   :  { %112 = dma.done.wait [#allocation4], 256  }
  0x3a   :  { %113 = vsyncadd [#allocation4], 4294967040 }
  0x3b   :  { %52 = vsyncpa [#allocation3], 1 }
  0x3c   :  { %53 = vsyncpa [#allocation4], 1 }

</bundles_post_ra>
